<compile_context>
chip_gen: v7x
topology: tpu7x:2x2x1
jax: 0.10.0
libtpu: 0.0.40
codegen_flags: <defaults>
</compile_context>

<pallas_src>
import jax
import jax.numpy as jnp
from jax.experimental import pallas as pl
from jax.experimental.pallas import tpu as pltpu


_LANES = 128
_SUBLANES = 8
_PAD_SENTINEL = 60.0  # softplus(-60) ~ 8.8e-27: padded elements contribute ~0 loss.


def _softplus(x):
    # Numerically-stable softplus: log1p(exp(x)) = max(x, 0) + log1p(exp(-|x|)).
    return jnp.maximum(x, 0.0) + jnp.log1p(jnp.exp(-jnp.abs(x)))


def _pair_loss_kernel(pos_ref, neg_ref, acc_ref):
    # acc_ref: (1, 8, 128) f32 output block, revisited across the reduction axis.
    @pl.when(pl.program_id(1) == 0)
    def _init():
        acc_ref[...] = jnp.zeros_like(acc_ref)

    p = pos_ref[...].astype(jnp.float32)       # (tile_r, 128)
    n = neg_ref[...].astype(jnp.float32)
    # BCE-with-logits: target 1 -> softplus(-x); target 0 -> softplus(x).
    tile_loss = _softplus(-p) + _softplus(n)   # (tile_r, 128)
    # Fold rows into one vreg-shaped (8, 128) slab: pure VPU adds, no per-step
    # XLU reduce and no per-step scalar store.
    acc_ref[...] += jnp.sum(
        tile_loss.reshape(-1, _SUBLANES, _LANES), axis=0, keepdims=True)


def _round_up(x, m):
    return -(-x // m) * m


def pair_loss(pos_score, neg_score, *, max_tile_rows=512, num_splits=2):
    """Pallas equivalent of PairLoss.forward(pos_score, neg_score)."""
    assert pos_score.shape == neg_score.shape
    n = pos_score.size
    assert n > 0

    rows = -(-n // _LANES)
    tile_r = min(max_tile_rows, _round_up(max(rows // num_splits, 1), _SUBLANES))
    tiles_per_split = -(-rows // (num_splits * tile_r))
    padded_rows = num_splits * tiles_per_split * tile_r
    pad = padded_rows * _LANES - n

    # Pad with sentinels whose loss contribution is ~0 (keeps kernel branch-free);
    # denominator below stays the true 2N. Native dtype is preserved.
    pos2d = jnp.pad(pos_score.reshape(-1), (0, pad),
                    constant_values=_PAD_SENTINEL).reshape(padded_rows, _LANES)
    neg2d = jnp.pad(neg_score.reshape(-1), (0, pad),
                    constant_values=-_PAD_SENTINEL).reshape(padded_rows, _LANES)

    in_map = lambda c, k: (c * tiles_per_split + k, 0)
    padded_elems = padded_rows * _LANES
    bytes_in = 2 * padded_elems * pos2d.dtype.itemsize

    partials = pl.pallas_call(
        _pair_loss_kernel,
        out_shape=jax.ShapeDtypeStruct((num_splits, _SUBLANES, _LANES), jnp.float32),
        grid=(num_splits, tiles_per_split),
        in_specs=[
            pl.BlockSpec((tile_r, _LANES), in_map),
            pl.BlockSpec((tile_r, _LANES), in_map),
        ],
        out_specs=pl.BlockSpec((1, _SUBLANES, _LANES), lambda c, k: (c, 0, 0)),
        compiler_params=pltpu.CompilerParams(
            dimension_semantics=("parallel", "arbitrary")),
        cost_estimate=pl.CostEstimate(
            flops=12 * padded_elems,
            transcendentals=4 * padded_elems,  # exp + log1p per pos & neg element
            bytes_accessed=bytes_in + num_splits * _SUBLANES * _LANES * 4),
    )(pos2d, neg2d)

    # Single tiny cross-lane reduce (num_splits*8*128 elems) + mean over true 2N.
    return jnp.sum(partials) / jnp.float32(2 * n)


def _reference_pair_loss(pos_score, neg_score):
    # Pure-JAX transcription of the PyTorch forward (for self-check).
    scores = jnp.concatenate([pos_score[:, None], neg_score[:, None]], axis=1)
    target = jnp.concatenate(
        [jnp.ones_like(pos_score)[:, None], jnp.zeros_like(neg_score)[:, None]],
        axis=1)
    x, y = scores.astype(jnp.float32), target.astype(jnp.float32)
    elem = jnp.maximum(x, 0.0) - x * y + jnp.log1p(jnp.exp(-jnp.abs(x)))
    return jnp.mean(elem)


if __name__ == "__main__":
    key = jax.random.PRNGKey(0)
    k1, k2 = jax.random.split(key)
    N = 256  # number of (pos, neg) score pairs
    pos_score = jax.random.normal(k1, (N,), dtype=jnp.float32) * 2.0
    neg_score = jax.random.normal(k2, (N,), dtype=jnp.float32) * 2.0

    loss = pair_loss(pos_score, neg_score)
    jax.block_until_ready(loss)

    ref = _reference_pair_loss(pos_score, neg_score)
    assert jnp.allclose(loss, ref, rtol=1e-5, atol=1e-5), (loss, ref)

    print("KERNEL_OK")
</pallas_src>

<mosaic_0001>
module attributes {stable_mosaic.version = 11 : i64} {
  func.func @_pair_loss_kernel(%arg0: i32, %arg1: i32, %arg2: memref<8x128xf32, #tpu.memory_space<vmem>>, %arg3: memref<8x128xf32, #tpu.memory_space<vmem>>, %arg4: memref<1x8x128xf32, #tpu.memory_space<vmem>>) attributes {dimension_semantics = [#tpu.dimension_semantics<parallel>, #tpu.dimension_semantics<arbitrary>], iteration_bounds = array<i64: 2, 1>, scalar_prefetch = 0 : i64, scratch_operands = 0 : i64, tpu.core_type = #tpu.core_type<tc>, window_params = [{transform_indices = @transform_0, window_bounds = array<i64: 8, 128>}, {transform_indices = @transform_1, window_bounds = array<i64: 8, 128>}, {transform_indices = @transform_2, window_bounds = array<i64: 1, 8, 128>}]} {
    %c0_i32 = arith.constant 0 : i32
    %0 = arith.cmpi eq, %arg1, %c0_i32 : i32
    %1 = arith.extui %0 : i1 to i32
    %c0_i32_0 = arith.constant 0 : i32
    %2 = arith.cmpi ne, %1, %c0_i32_0 : i32
    scf.if %2 {
      %cst_15 = arith.constant 0.000000e+00 : f32
      %30 = vector.broadcast %cst_15 : f32 to vector<1x8x128xf32>
      %c0_16 = arith.constant 0 : index
      %c0_17 = arith.constant 0 : index
      %c0_18 = arith.constant 0 : index
      %31 = vector.load %arg4[%c0_16, %c0_17, %c0_18] : memref<1x8x128xf32, #tpu.memory_space<vmem>>, vector<1x8x128xf32>
      tpu.vector_store %arg4[%c0_16, %c0_17, %c0_18], %30 {strides = array<i32>} : memref<1x8x128xf32, #tpu.memory_space<vmem>>, vector<1x8x128xf32>,
    } else {
    }
    %c0 = arith.constant 0 : index
    %c0_1 = arith.constant 0 : index
    %3 = vector.load %arg2[%c0, %c0_1] : memref<8x128xf32, #tpu.memory_space<vmem>>, vector<8x128xf32>
    %c0_2 = arith.constant 0 : index
    %c0_3 = arith.constant 0 : index
    %4 = vector.load %arg3[%c0_2, %c0_3] : memref<8x128xf32, #tpu.memory_space<vmem>>, vector<8x128xf32>
    %cst = arith.constant 0.000000e+00 : f32
    %5 = vector.broadcast %cst : f32 to vector<8x128xf32>
    %6 = arith.subf %5, %3 : vector<8x128xf32>
    %cst_4 = arith.constant 0.000000e+00 : f32
    %7 = vector.broadcast %cst_4 : f32 to vector<8x128xf32>
    %8 = arith.maximumf %6, %7 : vector<8x128xf32>
    %9 = math.absf %6 : vector<8x128xf32>
    %cst_5 = arith.constant 0.000000e+00 : f32
    %10 = vector.broadcast %cst_5 : f32 to vector<8x128xf32>
    %11 = arith.subf %10, %9 : vector<8x128xf32>
    %12 = math.exp %11 : vector<8x128xf32>
    %13 = math.log1p %12 : vector<8x128xf32>
    %14 = arith.addf %8, %13 : vector<8x128xf32>
    %cst_6 = arith.constant 0.000000e+00 : f32
    %15 = vector.broadcast %cst_6 : f32 to vector<8x128xf32>
    %16 = arith.maximumf %4, %15 : vector<8x128xf32>
    %17 = math.absf %4 : vector<8x128xf32>
    %cst_7 = arith.constant 0.000000e+00 : f32
    %18 = vector.broadcast %cst_7 : f32 to vector<8x128xf32>
    %19 = arith.subf %18, %17 : vector<8x128xf32>
    %20 = math.exp %19 : vector<8x128xf32>
    %21 = math.log1p %20 : vector<8x128xf32>
    %22 = arith.addf %16, %21 : vector<8x128xf32>
    %23 = arith.addf %14, %22 : vector<8x128xf32>
    %c0_8 = arith.constant 0 : index
    %c0_9 = arith.constant 0 : index
    %c0_10 = arith.constant 0 : index
    %24 = vector.load %arg4[%c0_8, %c0_9, %c0_10] : memref<1x8x128xf32, #tpu.memory_space<vmem>>, vector<1x8x128xf32>
    %25 = vector.shape_cast %23 : vector<8x128xf32> to vector<1x8x128xf32>
    %cst_11 = arith.constant dense<0.000000e+00> : vector<8x128xf32>
    %26 = vector.multi_reduction <add>, %25, %cst_11 [0] : vector<1x8x128xf32> to vector<8x128xf32>
    %27 = vector.shape_cast %26 : vector<8x128xf32> to vector<1x8x128xf32>
    %28 = arith.addf %24, %27 : vector<1x8x128xf32>
    %c0_12 = arith.constant 0 : index
    %c0_13 = arith.constant 0 : index
    %c0_14 = arith.constant 0 : index
    %29 = vector.load %arg4[%c0_12, %c0_13, %c0_14] : memref<1x8x128xf32, #tpu.memory_space<vmem>>, vector<1x8x128xf32>
    tpu.vector_store %arg4[%c0_12, %c0_13, %c0_14], %28 {strides = array<i32>} : memref<1x8x128xf32, #tpu.memory_space<vmem>>, vector<1x8x128xf32>,
    return
  }
  func.func @transform_0(%arg0: i32, %arg1: i32) -> (i32, i32) {
    %c1_i32 = arith.constant 1 : i32
    %0 = arith.muli %arg0, %c1_i32 : i32
    %1 = arith.addi %0, %arg1 : i32
    %c0_i32 = arith.constant 0 : i32
    %c0_i32_0 = arith.constant 0 : i32
    return %1, %c0_i32 : i32, i32
  }
  func.func @transform_1(%arg0: i32, %arg1: i32) -> (i32, i32) {
    %c1_i32 = arith.constant 1 : i32
    %0 = arith.muli %arg0, %c1_i32 : i32
    %1 = arith.addi %0, %arg1 : i32
    %c0_i32 = arith.constant 0 : i32
    %c0_i32_0 = arith.constant 0 : i32
    return %1, %c0_i32 : i32, i32
  }
  func.func @transform_2(%arg0: i32, %arg1: i32) -> (i32, i32, i32) {
    %c0_i32 = arith.constant 0 : i32
    %c0_i32_0 = arith.constant 0 : i32
    %c0_i32_1 = arith.constant 0 : i32
    return %arg0, %c0_i32, %c0_i32_0 : i32, i32, i32
  }
}

</mosaic_0001>

<bundles_post_ra>
// kernel: tpu_custom_call.1
= control target key start
LH: loop header
LB: loop body
LE: loop exit
PB: predicated region body
PF: predicated region fallthrough
CT: control target
= control target key end

     0   :  { %7 = vsyncpa [#allocation3], 0  ;;  %s859_s0 = inlined_call_operand.hbm [shape: f32[16,128], index: 0, kind: input, shape index: {}]   ;;  %s860_s1 = inlined_call_operand.hbm [shape: f32[16,128], index: 1, kind: input, shape index: {}]   ;;  %s861_s2 = inlined_call_operand.hbm [shape: f32[2,8,128], index: 2, kind: output, shape index: {}]  }
   0x1   :  { %9 = vsyncpa [#allocation3 + $0x1], 0 }
   0x2   :  { %10 = vsyncpa [#allocation6], 0 }
   0x3   :  { %12 = vsyncpa [#allocation6 + $0x1], 0 }
   0x4   :  { %13 = vsyncpa [#allocation4], 0 }
   0x5   :  { %15 = vsyncpa [#allocation4 + $0x1], 0  ;;  %s634_s9 = smov 0   ;;  %s636_s10 = smov 0  }
   0x6   :  { %s638_s11 = smov 0   ;;  %s640_s12 = smov 0  }
   0x7   :  { %s642_s13 = smov 0   ;;  %s644_s14 = smov 0  }
   0x8 LB: > { %s376_s15 = sadd.s32 4294967295, %s614_s14   ;;  %s377_s16 = sadd.s32 4294967294, %s614_s14   ;;  %s614_s14 = sphi %s644_s14, %s21_s14   ;;  %s610_s13 = sphi %s642_s13, %s881_s13   ;;  %s606_s12 = sphi %s640_s12, %s880_s12   ;;  %s602_s11 = sphi %s638_s11, %s879_s11   ;;  %s598_s10 = sphi %s636_s10, %s878_s10   ;;  %s594_s9 = sphi %s634_s9, %s877_s9  }
   0x9   : > { %s33_s17 = sadd.s32 1, %s610_s13  ;;  %s42_s18 = sadd.s32 1, %s602_s11 }
   0xa   : > { %p35_p0 = scmp.ge.s32.totalorder %s33_s17, 2  ;;  %p49_p1 = scmp.ne.s32.totalorder %s602_s11, %s598_s10 }
   0xb   : > { %p50_p2 = scmp.eq.s32.totalorder %s614_s14, 0  ;;  %p55_p3 = scmp.ne.s32.totalorder %s598_s10, %s594_s9 }
   0xc   : > { %s883_s17 = smov (%p35_p0, %s33_s17), 0  ;;  %p56_p5 = scmp.eq.s32.totalorder %s376_s15, 0 }
   0xd   : > { %p675_p4 = por %p50_p2, %p49_p1  ;;  %s39_s20 = ssub.s32 %s610_s13, %s883_s17 }
   0xe   : > { %p107_p6 = scmp.eq.s32.totalorder %s376_s15, 1  ;;  %p40_p7 = scmp.eq.s32.totalorder %s39_s20, 0 }
   0xf   : > { %p681_p8 = por %p56_p5, %p55_p3  ;;  %p113_p10 = scmp.eq.s32.totalorder %s377_s16, 1 }
  0x10   : > { %p685_p9 = por %p107_p6, %p49_p1  ;;  %p409_p13 = scmp.lt.s32.totalorder %s614_s14, 2 }
  0x11   : > { %s865_s21 = scalar_select %p681_p8, 1, 0 }
  0x12   : > { %s866_s22 = scalar_select %p685_p9, 1, 0 }
  0x13   : > { %s690_s23 = scalar_select %p40_p7, %s602_s11, %s42_s18  }
  0x14   : > { %p692_p11 = por %p113_p10, %p55_p3  ;;  %s699_s25 = sand.u32 1, %s602_s11  }
  0x15   : > { %s380_s26 = sshll.u32 %s699_s25, 3  ;;  %s381_s27 = sshll.u32 %s610_s13, 7 }
  0x16   : > { %s867_s24 = scalar_select %p692_p11, 1, 0 }
  0x17   : > { %s708_s30 = scalar_lea.hbm %s859_s0, %s381_s27  ;;  %s137_s3 = scalar_lea.vmem [#allocation2], %s380_s26 }
  0x18   : > { %s145_s4 = sshll.u32 %s137_s3, 4  ;;  %p716_p0 = pnand %p409_p13, %p675_p4  ;;  %s712_s4 = int_to_ptr.vmem [resolvable:$true] %s145_s4 }
  0x19   : > { %s134_s6 = scalar_lea.sflag [#allocation3], %s699_s25  ;;  %s468_s7 = scalar_lea.hbm %s708_s30, 128 }
  0x1a   : > { %p469_p3 = scmp.ne.s32.totalorder %s708_s30, %s468_s7  ;;  %p470_p5 = pneg %p716_p0 }
  0x1b   : > { %s473_s16 = scalar_lea.hbm %s859_s0, 256  ;;  %p474_p4 = scmp.lt.u32.totalorder %s708_s30, %s859_s0 }
  0x1c   : > { %p471_p6 = pnand %p470_p5, %p469_p3  ;;  %p475_p10 = scmp.lt.u32.totalorder %s473_s16, %s468_s7 }
  0x1d   : > { %p477_p12 = scmp.lt.u32.totalorder %s468_s7, %s708_s30 }
  0x1e   : > { %p472_p7 = pneg %p471_p6  ;;  %p476_p13 = por %p475_p10, %p474_p4 }
  0x20   : > { %p478_p1 = por %p477_p12, %p476_p13 }
  0x22   : > { %p479_p2 = pnand %p478_p1, %p472_p7 }
  0x24   : > { %482 = shalt.err (!%p479_p2)
}
  0x25   : > { %s483_s20 = scalar_lea.vmem %s712_s4, 128  ;;  %s616_s28 = smov [#allocation2]  }
  0x26   : > { %p484_p3 = scmp.ne.s32.totalorder %s712_s4, %s483_s20  ;;  %s488_s29 = sshll.u32 %s616_s28, 4  ;;  %s489_s29 = int_to_ptr.vmem [resolvable:$false] %s488_s29 }
  0x27   : > { %s490_s3 = scalar_lea.vmem %s489_s29, 256  ;;  %p491_p9 = scmp.lt.s32.totalorder %s712_s4, %s489_s29 }
  0x28   : > { %p486_p6 = pnand %p484_p3, %p470_p5  ;;  %p492_p4 = scmp.lt.s32.totalorder %s490_s3, %s483_s20 }
  0x2a   : > { %p487_p11 = pneg %p486_p6  ;;  %p493_p10 = por %p492_p4, %p491_p9 }
  0x2c   : > { %p494_p12 = pnand %p493_p10, %p487_p11 }
  0x2e   : > { %497 = shalt.err (!%p494_p12)
}
  0x2f   : > { %401 = dma.hbm_to_vmem [thread:$0]  (!%p716_p0), %s708_s30, 128, %s712_s4, %s134_s6  }
  0x30   : > { %p869_p1 = scmp.lt.s32.totalorder %s614_s14, 3  ;;  %p870_p2 = scmp.ge.s32.totalorder %s614_s14, 1 }
  0x31   : > { %s761_s16 = scalar_lea.hbm %s860_s1, %s381_s27  ;;  %s156_s18 = scalar_lea.vmem [#allocation5], %s380_s26 }
  0x32   : > { %p752_p7 = pnand %p870_p2, %p869_p1  ;;  %s164_s19 = sshll.u32 %s156_s18, 4  ;;  %s165_s19 = int_to_ptr.vmem [resolvable:$true] %s164_s19 }
  0x33   : > { %s153_s30 = scalar_lea.sflag [#allocation6], %s699_s25  ;;  %s498_s4 = scalar_lea.hbm %s761_s16, 128 }
  0x34   : > { %s871_s7 = scalar_select %p752_p7, 1, 0 }
  0x35   : > { %p499_p9 = scmp.ne.s32.totalorder %s761_s16, %s498_s4  ;;  %s503_s27 = scalar_lea.hbm %s860_s1, 256 }
  0x36   : > { %p504_p3 = scmp.lt.u32.totalorder %s761_s16, %s860_s1  ;;  %p505_p6 = scmp.lt.u32.totalorder %s503_s27, %s498_s4 }
  0x37   : > { %p501_p11 = pnand %p499_p9, %p470_p5  ;;  %p507_p10 = scmp.lt.u32.totalorder %s498_s4, %s761_s16 }
  0x38   : > { %p506_p4 = por %p505_p6, %p504_p3 }
  0x39   : > { %p502_p13 = pneg %p501_p11 }
  0x3a   : > { %p508_p12 = por %p507_p10, %p506_p4 }
  0x3c   : > { %p509_p1 = pnand %p508_p12, %p502_p13 }
  0x3e   : > { %512 = shalt.err (!%p509_p1)
}
  0x3f   : > { %s513_s25 = scalar_lea.vmem %s165_s19, 128  ;;  %s617_s26 = smov [#allocation5]  }
  0x40   : > { %p514_p2 = scmp.ne.s32.totalorder %s165_s19, %s513_s25  ;;  %s518_s3 = sshll.u32 %s617_s26, 4  ;;  %s519_s3 = int_to_ptr.vmem [resolvable:$false] %s518_s3 }
  0x41   : > { %s520_s8 = scalar_lea.vmem %s519_s3, 256  ;;  %p521_p8 = scmp.lt.s32.totalorder %s165_s19, %s519_s3 }
  0x42   : > { %p516_p9 = pnand %p514_p2, %p470_p5  ;;  %p522_p7 = scmp.lt.s32.totalorder %s520_s8, %s513_s25 }
  0x44   : > { %p517_p11 = pneg %p516_p9  ;;  %p523_p3 = por %p522_p7, %p521_p8 }
  0x46   : > { %p524_p6 = pnand %p523_p3, %p517_p11 }
  0x48   : > { %527 = shalt.err (!%p524_p6)
}
  0x49   : > { %404 = dma.hbm_to_vmem [thread:$0]  (!%p716_p0), %s761_s16, 128, %s165_s19, %s153_s30  }
  0x4a   : > { %p872_p13 = scmp.ne.s32.totalorder %s871_s7, 0 }
  0x4b   : > { %s788_s15 = sand.u32 (!%p872_p13), 1, %s598_s10   ;;  %p873_p8 = scmp.ne.s32.totalorder (!%p872_p13), %s865_s21, 0 }
  0x4c   : > { %173 = sbr.rel (%p872_p13) target bundleno = 140 (0x8c), region = 28  ;;  %s791_s18 = sshll.u32 (!%p872_p13), %s788_s15, 3 }
  0x4d   : > { %s176_s4 = scalar_lea.sflag (!%p872_p13), [#allocation3], %s788_s15  ;;  %s179_s6 = scalar_lea.vmem (!%p872_p13), [#allocation2], %s791_s18 }
  0x53   : > { %581 = dma.done.wait (%p873_p8), %s176_s4, 128  }
  0x54   : > { %583 = vsyncadd (%p873_p8), %s176_s4, 4294967168  ;;  %s185_s5 = scalar_lea.sflag [#allocation6], %s788_s15  ;;  %s188_s7 = scalar_lea.vmem [#allocation5], %s791_s18 }
  0x55   : > { %585 = dma.done.wait (%p873_p8), %s185_s5, 128  }
  0x56   : > { %587 = vsyncadd (%p873_p8), %s185_s5, 4294967168  ;;  %v221_v0 = vld [vmem:[%s179_s6] sm:$0xff]  ;;  %v222_v1 = vld [vmem:[%s188_s7] sm:$0xff]  ;;  %s389_s21 = sshll.u32 %s606_s12, 7  ;;  %s213_s16 = scalar_lea.vmem [#allocation7], %s791_s18 }
  0x57   : > { %v223_v2 = vsub.f32 0.0, %v221_v0  ;;  %v240_v3 = vand.u32 2147483647, %v222_v1  ;;  %v239_v21 = vmax.f32 %v222_v1, 0.0  ;;  %s273_s19 = sshll.u32 %s213_s16, 4  ;;  %s810_s27 = scalar_lea.hbm %s861_s2, %s389_s21  ;;  %s812_s19 = int_to_ptr.vmem [resolvable:$true] %s273_s19 }
  0x58   : > { %s260_s28 = scalar_lea.sflag [#allocation4], %s788_s15  ;;  %s528_s29 = scalar_lea.vmem %s812_s19, 128 }
  0x59   : > { %v225_v4 = vand.u32 2147483647, %v223_v2  ;;  %v241_v5 = vsub.f32 0.0, %v240_v3  ;;  %v224_v25 = vmax.f32 %v223_v2, 0.0  ;;  %p529_p0 = scmp.ne.s32.totalorder %s812_s19, %s528_s29  ;;  %p874_p5 = scmp.ne.s32.totalorder %s866_s22, 0 }
  0x5a   : > { %s618_s12 = smov [#allocation7]  }
  0x5b   : > { %v226_v6 = vsub.f32 0.0, %v225_v4  ;;  %v242_v7 = vmul.f32 1.442695, %v241_v5  ;;  %p530_p7 = pnand %p529_p0, %p874_p5  ;;  %s532_s25 = sshll.u32 %s618_s12, 4  ;;  %s533_s25 = int_to_ptr.vmem [resolvable:$false] %s532_s25 }
  0x5c   : > { %s534_s26 = scalar_lea.vmem %s533_s25, 256  ;;  %p535_p10 = scmp.lt.s32.totalorder %s812_s19, %s533_s25 }
  0x5d   : > { %v227_v8 = vmul.f32 1.442695, %v226_v6  ;;  %460 = vpow2.f32 %v242_v7  ;;  %p531_p4 = pneg %p530_p7  ;;  %p536_p12 = scmp.lt.s32.totalorder %s534_s26, %s528_s29 }
  0x5f   : > { %462 = vpow2.f32 %v227_v8  ;;  %p537_p1 = por %p536_p12, %p535_p10 }
  0x61   : > { %p538_p2 = pnand %p537_p1, %p531_p4 }
  0x67   : > { %v461_v9 = vpop.eup %460 }
  0x68   : > { %v244_v10 = vadd.f32 1.0, %v461_v9  ;;  %v247_v13 = vmul.f32 -0.5, %v461_v9  ;;  %v250_v16 = vand.u32 2147483647, %v461_v9 }
  0x69   : > { %v463_v11 = vpop.eup %462 }
  0x6a   : > { %v229_v12 = vadd.f32 1.0, %v463_v11  ;;  %464 = vlog2.f32 %v244_v10  ;;  %v232_v14 = vmul.f32 -0.5, %v463_v11  ;;  %v248_v15 = vadd.f32 1.0, %v247_v13 }
  0x6b   : > { %v235_v18 = vand.u32 2147483647, %v463_v11  ;;  %vm251_vm0 = vcmp.lt.f32.partialorder %v250_v16, 0.0004427343 }
  0x6c   : > { %466 = vlog2.f32 %v229_v12  ;;  %v233_v17 = vadd.f32 1.0, %v232_v14  ;;  %v249_v19 = vmul.f32 %v461_v9, %v248_v15 }
  0x6d   : > { %vm236_vm1 = vcmp.lt.f32.partialorder %v235_v18, 0.0004427343 }
  0x6e   : > { %v234_v22 = vmul.f32 %v463_v11, %v233_v17 }
  0x74   : > { %v465_v20 = vpop.eup %464 }
  0x75   : > { %v246_v23 = vmul.f32 0.6931472, %v465_v20 }
  0x76   : > { %v467_v24 = vpop.eup %466 }
  0x77   : > { %v231_v26 = vmul.f32 0.6931472, %v467_v24  ;;  %v252_v27 = vsel %vm251_vm0, %v249_v19, %v246_v23 }
  0x78   : > { %v253_v28 = vadd.f32 %v252_v27, %v239_v21 }
  0x79   : > { %v237_v29 = vsel %vm236_vm1, %v234_v22, %v231_v26 }
  0x7a   : > { %v238_v30 = vadd.f32 %v237_v29, %v224_v25 }
  0x7c   : > { %v254_v31 = vadd.f32 %v253_v28, %v238_v30 }
  0x7e   : > { %258 = vst [vmem:[%s213_s16] sm:$0xff] %v254_v31 }
  0x7f   : > { %541 = shalt.err (!%p538_p2)
}
  0x80   : > { %s542_s3 = scalar_lea.hbm %s810_s27, 128  ;;  %s546_s18 = scalar_lea.hbm %s861_s2, 256 }
  0x81   : > { %p543_p9 = scmp.ne.s32.totalorder %s810_s27, %s542_s3  ;;  %p547_p6 = scmp.lt.u32.totalorder %s810_s27, %s861_s2 }
  0x82   : > { %p548_p13 = scmp.lt.u32.totalorder %s546_s18, %s542_s3  ;;  %p550_p0 = scmp.lt.u32.totalorder %s542_s3, %s810_s27 }
  0x83   : > { %p544_p11 = pnand %p543_p9, %p874_p5 }
  0x84   : > { %p549_p8 = por %p548_p13, %p547_p6 }
  0x85   : > { %p545_p3 = pneg %p544_p11 }
  0x86   : > { %p551_p7 = por %p550_p0, %p549_p8 }
  0x88   : > { %p552_p4 = pnand %p551_p7, %p545_p3 }
  0x8a   : > { %555 = shalt.err (!%p552_p4)
}
  0x8b   : > { %396 = dma.vmem_to_hbm [thread:$0]  (%p874_p5), %s812_s19, 128, %s810_s27, %s260_s28  }
  0x8c PF: > { %s285_s5 = sand.u32 1, %s594_s9   ;;  %p875_p10 = scmp.ne.s32.totalorder %s867_s24, 0 }
  0x8d   : > { %p876_p12 = scmp.ge.s32.totalorder %s614_s14, 2  ;;  %s286_s7 = scalar_lea.sflag [#allocation4], %s285_s5 }
  0x8f   : > { %p406_p1 = pnand %p876_p12, %p875_p10 }
  0x91   : > { %589 = dma.done.wait (!%p406_p1), %s286_s7, 128  }
  0x92   : > { %591 = vsyncadd (!%p406_p1), %s286_s7, 4294967168  ;;  %s21_s14 = sadd.s32 1, %s614_s14   ;;  %s877_s9 = smov %s598_s10 }
  0x93   : > { %p18_p2 = scmp.ge.s32.totalorder %s21_s14, 4   ;;  %s878_s10 = smov %s602_s11 }
  0x94   : > { %s879_s11 = smov %s690_s23  ;;  %s880_s12 = smov %s610_s13 }
  0x95   : > { %s881_s13 = smov %s883_s17  ;;  %20 = sbr.rel (!%p18_p2) target bundleno = 8 (0x8), region = 90 }
  0x9c   :  { %291 = vsyncpa [#allocation3], 1 }
  0x9d   :  { %293 = vsyncpa [#allocation3 + $0x1], 1 }
  0x9e   :  { %294 = vsyncpa [#allocation6], 1 }
  0x9f   :  { %296 = vsyncpa [#allocation6 + $0x1], 1 }
  0xa0   :  { %297 = vsyncpa [#allocation4], 1 }
  0xa1   :  { %299 = vsyncpa [#allocation4 + $0x1], 1 }

</bundles_post_ra>
